<compile_context>
chip_gen: v5e
topology: v5e:2x2
jax: 0.10.0
libtpu: 0.0.40
codegen_flags: <defaults>
</compile_context>

<pallas_src>
import functools
import math

import jax
import jax.numpy as jnp
from jax import lax
from jax.experimental import pallas as pl
from jax.experimental.pallas import tpu as pltpu


def _flash_qkv_kernel(q_ref, k_ref, v_ref, o_ref, m_sc, l_sc, acc_sc, *, scale2):
    """One (batch, head, q-tile, k-tile) step of flash attention.

    q_ref: (1, ch, tq)   k_ref/v_ref: (1, ch, tk)   o_ref: (1, ch, tq)
    Scratch: m_sc/l_sc (1, tq) f32, acc_sc (ch, tq) f32 (persist across k-tiles).
    """
    ki = pl.program_id(3)

    @pl.when(ki == 0)
    def _():
        m_sc[...] = jnp.full_like(m_sc, -jnp.inf)
        l_sc[...] = jnp.zeros_like(l_sc)
        acc_sc[...] = jnp.zeros_like(acc_sc)

    q = q_ref[0]  # (ch, tq), input dtype (bf16 stays bf16 for the MXU)
    k = k_ref[0]  # (ch, tk)
    v = v_ref[0]  # (ch, tk)

    # s[kpos, t] = sum_c k[c, kpos] * q[c, t]  -> (tk, tq), f32 accumulation.
    # Transposed score layout: softmax axis is the sublane axis, so the
    # running max / sum broadcast over (ch, tq) without any transposes.
    s = lax.dot_general(k, q, (((0,), (0,)), ((), ())),
                        preferred_element_type=jnp.float32)
    s = s * scale2  # folded (q*scale)·(k*scale) == s / sqrt(ch), once, in f32

    m_prev = m_sc[...]                                            # (1, tq)
    m_new = jnp.maximum(m_prev, jnp.max(s, axis=0, keepdims=True))
    alpha = jnp.exp(m_prev - m_new)                               # (1, tq)
    p = jnp.exp(s - m_new)                                        # (tk, tq) f32
    l_sc[...] = alpha * l_sc[...] + jnp.sum(p, axis=0, keepdims=True)

    # acc[c, t] += sum_kpos v[c, kpos] * p[kpos, t]  -> (ch, tq)
    # (p cast back to the input dtype, matching torch's .type(weight.dtype))
    pv = lax.dot_general(v, p.astype(v.dtype), (((1,), (0,)), ((), ())),
                         preferred_element_type=jnp.float32)
    acc_sc[...] = alpha * acc_sc[...] + pv
    m_sc[...] = m_new

    @pl.when(ki == pl.num_programs(3) - 1)
    def _():
        inv_l = pl.reciprocal(l_sc[...], approx=True)             # EUP, not VALU
        o_ref[0] = (acc_sc[...] * inv_l).astype(o_ref.dtype)


def _pick_tile(length: int, target: int) -> int:
    """Largest tile <= target that is a multiple of 128 and divides length;
    falls back to the full length when it is not 128-aligned."""
    if length % 128 != 0:
        return length
    t = min(target, length)
    t -= t % 128
    while length % t != 0:
        t -= 128
    return t


def qkv_attention(qkv: jax.Array, num_heads: int = 1, *,
                  tq_target: int = 256, tk_target: int = 128) -> jax.Array:
    """Pallas equivalent of QKVAttention.forward.

    qkv: (bs, width, length) with width = 3 * num_heads * ch (channels-first).
    returns: (bs, num_heads * ch, length), same dtype as qkv.
    """
    bs, width, length = qkv.shape
    assert width % (3 * num_heads) == 0
    ch = width // (3 * num_heads)
    assert ch % 8 == 0, "per-head channel count must be a multiple of 8 (TPU sublane)"
    scale2 = 1.0 / math.sqrt(ch)  # (1/ch**0.25)**2 folded into one multiply

    tq = _pick_tile(length, tq_target)
    tk = _pick_tile(length, tk_target)
    n_q = length // tq
    n_k = length // tk

    # Index directly into the packed qkv (block units: width blocks of ch,
    # length blocks of tq/tk).  No slicing / reshaping copies in HBM.
    q_map = lambda b, h, qi, ki: (b, h, qi)
    k_map = lambda b, h, qi, ki: (b, num_heads + h, ki)
    v_map = lambda b, h, qi, ki: (b, 2 * num_heads + h, ki)
    o_map = lambda b, h, qi, ki: (b, h, qi)

    out = pl.pallas_call(
        functools.partial(_flash_qkv_kernel, scale2=scale2),
        out_shape=jax.ShapeDtypeStruct((bs, num_heads * ch, length), qkv.dtype),
        grid_spec=pltpu.PrefetchScalarGridSpec(
            num_scalar_prefetch=0,
            grid=(bs, num_heads, n_q, n_k),
            in_specs=[pl.BlockSpec((1, ch, tq), q_map),
                      pl.BlockSpec((1, ch, tk), k_map),
                      pl.BlockSpec((1, ch, tk), v_map)],
            out_specs=pl.BlockSpec((1, ch, tq), o_map),
            scratch_shapes=[pltpu.VMEM((1, tq), jnp.float32),    # running max
                            pltpu.VMEM((1, tq), jnp.float32),    # running sum
                            pltpu.VMEM((ch, tq), jnp.float32)]), # output acc
        compiler_params=pltpu.CompilerParams(
            dimension_semantics=("parallel", "parallel", "parallel", "arbitrary"),
            vmem_limit_bytes=32 * 1024 * 1024),
    )(qkv, qkv, qkv)

    return out


def _reference(qkv: jax.Array, num_heads: int) -> jax.Array:
    # Pure-JAX transcription of the PyTorch forward, for verification.
    bs, width, length = qkv.shape
    ch = width // (3 * num_heads)
    hc = num_heads * ch
    q, k, v = qkv[:, :hc], qkv[:, hc:2 * hc], qkv[:, 2 * hc:]
    scale = 1.0 / math.sqrt(math.sqrt(ch))
    qr = (q * scale).reshape(bs * num_heads, ch, length)
    kr = (k * scale).reshape(bs * num_heads, ch, length)
    vr = v.reshape(bs * num_heads, ch, length)
    w = jnp.einsum('bct,bcs->bts', qr, kr)
    w = jax.nn.softmax(w.astype(jnp.float32), axis=-1).astype(w.dtype)
    a = jnp.einsum('bts,bcs->bct', w, vr)
    return a.reshape(bs, hc, length)


if __name__ == "__main__":
    key = jax.random.PRNGKey(0)

    # Case 1: small shapes consistent with the module: bs=2, H=2, ch=8, L=16.
    num_heads = 2
    bs, ch, length = 2, 8, 16
    width = 3 * num_heads * ch  # 48
    k1, k2 = jax.random.split(key)
    qkv = jax.random.normal(k1, (bs, width, length), dtype=jnp.float32)

    out = jax.block_until_ready(qkv_attention(qkv, num_heads=num_heads))
    ref = _reference(qkv, num_heads)
    assert out.shape == (bs, num_heads * ch, length)
    # Tolerance covers the EUP approx-reciprocal used for the softmax denom.
    assert jnp.allclose(out, ref, atol=1e-2, rtol=1e-2)

    # Case 2: 128-aligned length to exercise the flash k-tile accumulation.
    num_heads2, ch2, length2 = 1, 32, 256
    qkv2 = jax.random.normal(k2, (1, 3 * num_heads2 * ch2, length2),
                             dtype=jnp.float32)
    out2 = jax.block_until_ready(qkv_attention(qkv2, num_heads=num_heads2))
    ref2 = _reference(qkv2, num_heads2)
    assert out2.shape == (1, num_heads2 * ch2, length2)
    assert jnp.allclose(out2, ref2, atol=1e-2, rtol=1e-2)

    print("KERNEL_OK")
</pallas_src>

<mosaic_0001>
module attributes {stable_mosaic.version = 11 : i64} {
  func.func @_flash_qkv_kernel(%arg0: i32, %arg1: i32, %arg2: i32, %arg3: i32, %arg4: memref<1x8x16xf32, #tpu.memory_space<vmem>>, %arg5: memref<1x8x16xf32, #tpu.memory_space<vmem>>, %arg6: memref<1x8x16xf32, #tpu.memory_space<vmem>>, %arg7: memref<1x8x16xf32, #tpu.memory_space<vmem>>, %arg8: memref<1x16xf32, #tpu.memory_space<vmem>>, %arg9: memref<1x16xf32, #tpu.memory_space<vmem>>, %arg10: memref<8x16xf32, #tpu.memory_space<vmem>>) attributes {dimension_semantics = [#tpu.dimension_semantics<parallel>, #tpu.dimension_semantics<parallel>, #tpu.dimension_semantics<parallel>, #tpu.dimension_semantics<arbitrary>], iteration_bounds = array<i64: 2, 2, 1, 1>, scalar_prefetch = 0 : i64, scratch_operands = 3 : i64, tpu.core_type = #tpu.core_type<tc>, window_params = [{transform_indices = @transform_0, window_bounds = array<i64: 1, 8, 16>}, {transform_indices = @transform_1, window_bounds = array<i64: 1, 8, 16>}, {transform_indices = @transform_2, window_bounds = array<i64: 1, 8, 16>}, {transform_indices = @transform_3, window_bounds = array<i64: 1, 8, 16>}]} {
    %c0_i32 = arith.constant 0 : i32
    %0 = arith.cmpi eq, %arg3, %c0_i32 : i32
    %1 = arith.extui %0 : i1 to i32
    %c0_i32_0 = arith.constant 0 : i32
    %2 = arith.cmpi ne, %1, %c0_i32_0 : i32
    scf.if %2 {
      %cst_27 = arith.constant 0xFF800000 : f32
      %37 = vector.broadcast %cst_27 : f32 to vector<1x16xf32>
      %c0_28 = arith.constant 0 : index
      %c0_29 = arith.constant 0 : index
      %38 = vector.load %arg8[%c0_28, %c0_29] : memref<1x16xf32, #tpu.memory_space<vmem>>, vector<1x16xf32>
      tpu.vector_store %arg8[%c0_28, %c0_29], %37 {strides = array<i32>} : memref<1x16xf32, #tpu.memory_space<vmem>>, vector<1x16xf32>,
      %cst_30 = arith.constant 0.000000e+00 : f32
      %39 = vector.broadcast %cst_30 : f32 to vector<1x16xf32>
      %c0_31 = arith.constant 0 : index
      %c0_32 = arith.constant 0 : index
      %40 = vector.load %arg9[%c0_31, %c0_32] : memref<1x16xf32, #tpu.memory_space<vmem>>, vector<1x16xf32>
      tpu.vector_store %arg9[%c0_31, %c0_32], %39 {strides = array<i32>} : memref<1x16xf32, #tpu.memory_space<vmem>>, vector<1x16xf32>,
      %cst_33 = arith.constant 0.000000e+00 : f32
      %41 = vector.broadcast %cst_33 : f32 to vector<8x16xf32>
      %c0_34 = arith.constant 0 : index
      %c0_35 = arith.constant 0 : index
      %42 = vector.load %arg10[%c0_34, %c0_35] : memref<8x16xf32, #tpu.memory_space<vmem>>, vector<8x16xf32>
      tpu.vector_store %arg10[%c0_34, %c0_35], %41 {strides = array<i32>} : memref<8x16xf32, #tpu.memory_space<vmem>>, vector<8x16xf32>,
    } else {
    }
    %c0 = arith.constant 0 : index
    %c0_1 = arith.constant 0 : index
    %c0_2 = arith.constant 0 : index
    %3 = vector.load %arg4[%c0, %c0_1, %c0_2] : memref<1x8x16xf32, #tpu.memory_space<vmem>>, vector<1x8x16xf32>
    %4 = vector.shape_cast %3 : vector<1x8x16xf32> to vector<8x16xf32>
    %c0_3 = arith.constant 0 : index
    %c0_4 = arith.constant 0 : index
    %c0_5 = arith.constant 0 : index
    %5 = vector.load %arg5[%c0_3, %c0_4, %c0_5] : memref<1x8x16xf32, #tpu.memory_space<vmem>>, vector<1x8x16xf32>
    %6 = vector.shape_cast %5 : vector<1x8x16xf32> to vector<8x16xf32>
    %c0_6 = arith.constant 0 : index
    %c0_7 = arith.constant 0 : index
    %c0_8 = arith.constant 0 : index
    %7 = vector.load %arg6[%c0_6, %c0_7, %c0_8] : memref<1x8x16xf32, #tpu.memory_space<vmem>>, vector<1x8x16xf32>
    %8 = vector.shape_cast %7 : vector<1x8x16xf32> to vector<8x16xf32>
    %cst = arith.constant dense<0.000000e+00> : vector<16x16xf32>
    %9 = tpu.matmul %6, %4, %cst {dimension_numbers = #tpu.dot_dimension_numbers<[0], [0], [1], [1], [0, 1, 1, 1], [], []>} : vector<8x16xf32>, vector<8x16xf32>, vector<16x16xf32> -> vector<16x16xf32>
    %cst_9 = arith.constant 0.353553385 : f32
    %10 = vector.broadcast %cst_9 : f32 to vector<16x16xf32>
    %11 = arith.mulf %9, %10 : vector<16x16xf32>
    %c0_10 = arith.constant 0 : index
    %c0_11 = arith.constant 0 : index
    %12 = vector.load %arg8[%c0_10, %c0_11] : memref<1x16xf32, #tpu.memory_space<vmem>>, vector<1x16xf32>
    %cst_12 = arith.constant dense<0xFF800000> : vector<16xf32>
    %13 = vector.multi_reduction <maximumf>, %11, %cst_12 [0] : vector<16x16xf32> to vector<16xf32>
    %14 = vector.shape_cast %13 : vector<16xf32> to vector<1x16xf32>
    %15 = arith.maximumf %12, %14 : vector<1x16xf32>
    %16 = arith.subf %12, %15 : vector<1x16xf32>
    %17 = math.exp %16 : vector<1x16xf32>
    %18 = vector.broadcast %15 : vector<1x16xf32> to vector<16x16xf32>
    %19 = arith.subf %11, %18 : vector<16x16xf32>
    %20 = math.exp %19 : vector<16x16xf32>
    %c0_13 = arith.constant 0 : index
    %c0_14 = arith.constant 0 : index
    %21 = vector.load %arg9[%c0_13, %c0_14] : memref<1x16xf32, #tpu.memory_space<vmem>>, vector<1x16xf32>
    %22 = arith.mulf %17, %21 : vector<1x16xf32>
    %cst_15 = arith.constant dense<0.000000e+00> : vector<16xf32>
    %23 = vector.multi_reduction <add>, %20, %cst_15 [0] : vector<16x16xf32> to vector<16xf32>
    %24 = vector.shape_cast %23 : vector<16xf32> to vector<1x16xf32>
    %25 = arith.addf %22, %24 : vector<1x16xf32>
    %c0_16 = arith.constant 0 : index
    %c0_17 = arith.constant 0 : index
    %26 = vector.load %arg9[%c0_16, %c0_17] : memref<1x16xf32, #tpu.memory_space<vmem>>, vector<1x16xf32>
    tpu.vector_store %arg9[%c0_16, %c0_17], %25 {strides = array<i32>} : memref<1x16xf32, #tpu.memory_space<vmem>>, vector<1x16xf32>,
    %cst_18 = arith.constant dense<0.000000e+00> : vector<8x16xf32>
    %27 = tpu.matmul %8, %20, %cst_18 {dimension_numbers = #tpu.dot_dimension_numbers<[1], [0], [0], [1], [0, 0, 1, 1], [], []>} : vector<8x16xf32>, vector<16x16xf32>, vector<8x16xf32> -> vector<8x16xf32>
    %c0_19 = arith.constant 0 : index
    %c0_20 = arith.constant 0 : index
    %28 = vector.load %arg10[%c0_19, %c0_20] : memref<8x16xf32, #tpu.memory_space<vmem>>, vector<8x16xf32>
    %29 = vector.broadcast %17 : vector<1x16xf32> to vector<8x16xf32>
    %30 = arith.mulf %29, %28 : vector<8x16xf32>
    %31 = arith.addf %30, %27 : vector<8x16xf32>
    %c0_21 = arith.constant 0 : index
    %c0_22 = arith.constant 0 : index
    %32 = vector.load %arg10[%c0_21, %c0_22] : memref<8x16xf32, #tpu.memory_space<vmem>>, vector<8x16xf32>
    tpu.vector_store %arg10[%c0_21, %c0_22], %31 {strides = array<i32>} : memref<8x16xf32, #tpu.memory_space<vmem>>, vector<8x16xf32>,
    %c0_23 = arith.constant 0 : index
    %c0_24 = arith.constant 0 : index
    %33 = vector.load %arg8[%c0_23, %c0_24] : memref<1x16xf32, #tpu.memory_space<vmem>>, vector<1x16xf32>
    tpu.vector_store %arg8[%c0_23, %c0_24], %15 {strides = array<i32>} : memref<1x16xf32, #tpu.memory_space<vmem>>, vector<1x16xf32>,
    %c0_i32_25 = arith.constant 0 : i32
    %34 = arith.cmpi eq, %arg3, %c0_i32_25 : i32
    %35 = arith.extui %34 : i1 to i32
    %c0_i32_26 = arith.constant 0 : i32
    %36 = arith.cmpi ne, %35, %c0_i32_26 : i32
    scf.if %36 {
      %c0_27 = arith.constant 0 : index
      %c0_28 = arith.constant 0 : index
      %37 = vector.load %arg9[%c0_27, %c0_28] : memref<1x16xf32, #tpu.memory_space<vmem>>, vector<1x16xf32>
      %38 = tpu.reciprocal %37 {approx = true} : vector<1x16xf32> -> vector<1x16xf32>
      %c0_29 = arith.constant 0 : index
      %c0_30 = arith.constant 0 : index
      %39 = vector.load %arg10[%c0_29, %c0_30] : memref<8x16xf32, #tpu.memory_space<vmem>>, vector<8x16xf32>
      %40 = vector.broadcast %38 : vector<1x16xf32> to vector<8x16xf32>
      %41 = arith.mulf %39, %40 : vector<8x16xf32>
      %c0_31 = arith.constant 0 : index
      %c0_32 = arith.constant 0 : index
      %c0_33 = arith.constant 0 : index
      %42 = vector.load %arg7[%c0_31, %c0_32, %c0_33] : memref<1x8x16xf32, #tpu.memory_space<vmem>>, vector<1x8x16xf32>
      %43 = vector.shape_cast %42 : vector<1x8x16xf32> to vector<8x16xf32>
      %44 = vector.shape_cast %41 : vector<8x16xf32> to vector<1x8x16xf32>
      tpu.vector_store %arg7[%c0_31, %c0_32, %c0_33], %44 {strides = array<i32>} : memref<1x8x16xf32, #tpu.memory_space<vmem>>, vector<1x8x16xf32>,
    } else {
    }
    return
  }
  func.func @transform_0(%arg0: i32, %arg1: i32, %arg2: i32, %arg3: i32) -> (i32, i32, i32) {
    %c0_i32 = arith.constant 0 : i32
    return %arg0, %arg1, %arg2 : i32, i32, i32
  }
  func.func @transform_1(%arg0: i32, %arg1: i32, %arg2: i32, %arg3: i32) -> (i32, i32, i32) {
    %c2_i32 = arith.constant 2 : i32
    %0 = arith.addi %c2_i32, %arg1 : i32
    %c0_i32 = arith.constant 0 : i32
    return %arg0, %0, %arg3 : i32, i32, i32
  }
  func.func @transform_2(%arg0: i32, %arg1: i32, %arg2: i32, %arg3: i32) -> (i32, i32, i32) {
    %c4_i32 = arith.constant 4 : i32
    %0 = arith.addi %c4_i32, %arg1 : i32
    %c0_i32 = arith.constant 0 : i32
    return %arg0, %0, %arg3 : i32, i32, i32
  }
  func.func @transform_3(%arg0: i32, %arg1: i32, %arg2: i32, %arg3: i32) -> (i32, i32, i32) {
    %c0_i32 = arith.constant 0 : i32
    return %arg0, %arg1, %arg2 : i32, i32, i32
  }
}

</mosaic_0001>

<bundles_post_ra>
// kernel: tpu_custom_call.1
= control target key start
LH: loop header
LB: loop body
LE: loop exit
PB: predicated region body
PF: predicated region fallthrough
CT: control target
= control target key end

     0   :  { %8 = vsyncpa [#allocation6], 0  ;;  %s989_s0 = inlined_call_operand.vmem [shape: f32[2,48,16], index: 0, kind: input, shape index: {}]   ;;  %s990_s1 = inlined_call_operand.vmem [shape: f32[2,48,16], index: 1, kind: input, shape index: {}]   ;;  %s991_s2 = inlined_call_operand.vmem [shape: f32[2,48,16], index: 2, kind: input, shape index: {}]   ;;  %s992_s3 = inlined_call_operand.hbm [shape: f32[2,16,16], index: 3, kind: output, shape index: {}]  }
   0x1   :  { %10 = vsyncpa [#allocation6 + $0x1], 0  ;;  %s842_s12 = smov 0   ;;  %s844_s13 = smov 0  }
   0x2   :  { %s846_s14 = smov 0   ;;  %s848_s15 = smov 0  }
   0x3   :  { %s850_s16 = smov 0   ;;  %s852_s17 = smov 0  }
   0x4   :  { %s854_s18 = smov 0   ;;  %s856_s19 = smov 0  }
   0x5 LB: > { %s624_s20 = sadd.s32 4294967295, %s818_s19   ;;  %s625_s21 = sadd.s32 4294967294, %s818_s19   ;;  %s818_s19 = sphi %s856_s19, %s16_s19   ;;  %s814_s18 = sphi %s854_s18, %s1001_s18   ;;  %s810_s17 = sphi %s852_s17, %s1000_s17   ;;  %s806_s16 = sphi %s850_s16, %s999_s16   ;;  %s802_s15 = sphi %s848_s15, %s998_s15   ;;  %s798_s14 = sphi %s846_s14, %s997_s14   ;;  %s794_s13 = sphi %s844_s13, %s996_s13   ;;  %s790_s12 = sphi %s842_s12, %s995_s12  }
   0x6   : > { %s38_s22 = sadd.s32 1, %s810_s17  ;;  %s42_s23 = sadd.s32 1, %s814_s18 }
   0x7   : > { %p40_p0 = scmp.ge.s32.totalorder %s38_s22, 2  ;;  %p157_p1 = scmp.ne.s32.totalorder %s798_s14, %s794_s13 }
   0x8   : > { %p158_p2 = scmp.eq.s32.totalorder %s624_s20, 3  ;;  %p163_p5 = scmp.ne.s32.totalorder %s794_s13, %s790_s12 }
   0x9   : > { %s1003_s22 = smov (%p40_p0, %s38_s22), 0  ;;  %s1005_s23 = smov (!%p40_p0, %s42_s23), %s814_s18 }
   0xa   : > { %s141_s24 = ssub.s32 %s810_s17, %s1003_s22  ;;  %p893_p3 = por %p158_p2, %p157_p1 }
   0xb   : > { %p44_p4 = scmp.ge.s32.totalorder %s1005_s23, 2  ;;  %p164_p6 = scmp.eq.s32.totalorder %s625_s21, 3 }
   0xc   : > { %p628_p7 = scmp.ge.s32.totalorder %s818_s19, 1  ;;  %p228_p9 = scmp.lt.s32.totalorder %s818_s19, 5 }
   0xd   : > { %s1007_s23 = smov (%p44_p4, %s1005_s23), 0  ;;  %p902_p8 = por %p164_p6, %p163_p5 }
   0xe   : > { %s140_s27 = ssub.s32 %s814_s18, %s1007_s23  ;;  %s147_s28 = sadd.s32 1, %s798_s14 }
   0xf   : > { %s142_s29 = sor.u32 %s141_s24, %s140_s27  ;;  %p229_p10 = pnand %p628_p7, %p228_p9 }
  0x10   : > { %p145_p11 = scmp.eq.s32.totalorder %s142_s29, 0  ;;  %p282_p12 = scmp.lt.s32.totalorder (!%p229_p10), %s806_s16, 1 }
  0x11   : > { %232 = sbr.rel (%p229_p10) target bundleno = 511 (0x1ff), region = 32  ;;  %s293_s4 = sadd.s32 (!%p229_p10), 2, %s802_s15 }
  0x12   : > { %s911_s30 = scalar_select %p145_p11, %s798_s14, %s147_s28  }
  0x13   : > { %p296_p13 = scmp.lt.s32.totalorder (!%p229_p10), %s293_s4, 5  ;;  %p284_p0 = scmp.lt.s32.totalorder (!%p229_p10), %s802_s15, 5 }
  0x16   : > { %s283_s5 = scalar_select %p282_p12, %s806_s16, 1  ;;  %vm363_vm0 = vcmask 64512   ;;  %vm323_vm1 = vcmask 122880   ;;  %v820_v4 = vmov -inf   ;;  %vm326_vm2 = vcmask 130048  }
  0x17   : > { %s1009_s4 = smov (!%p296_p13, %s293_s4), 5  ;;  %324 = vst.msk [vmem:[#allocation2] sm:$0x1] %vm323_vm1, %v820_v4  ;;  %v821_v5 = vmov 0.0  }
  0x18   : > { %s916_s6 = smul.u32 6, %s283_s5  ;;  %325 = vst.msk [vmem:[#allocation3] sm:$0x1] %vm323_vm1, %v821_v5 }
  0x19   : > { %s285_s20 = scalar_select %p284_p0, %s802_s15, 5  ;;  %327 = vst.msk [vmem:[#allocation4] sm:$0xff] %vm326_vm2, %v821_v5 }
  0x1a   : > { %s302_s7 = sadd.s32 %s916_s6, %s1009_s4  ;;  %s306_s4 = sadd.s32 4, %s802_s15 }
  0x1b   : > { %s631_s8 = sshll.u32 %s302_s7, 3  ;;  %s290_s21 = sadd.s32 %s916_s6, %s285_s20 }
  0x1c   : > { %s304_s11 = scalar_lea.vmem %s990_s1, %s631_s8  ;;  %s630_s24 = sshll.u32 %s290_s21, 3 }
  0x1d   : > { %v329_v0 = vld [vmem:[%s304_s11] sm:$0xff]  ;;  %s292_s29 = scalar_lea.vmem %s989_s0, %s630_s24  ;;  %p309_p1 = scmp.lt.s32.totalorder %s306_s4, 5 }
  0x1e   : > { %331 = vxpose.xlu0.b32.start.end [1/1] (short) (narrow) %v329_v0, 16  ;;  %v328_v1 = vld [vmem:[%s292_s29] sm:$0xff]  ;;  %s279_s11 = sand.u32 1, %s794_s13  }
  0x1f   : > { %385 = vmatpush.msra.mxu0 %v328_v1  ;;  %641 = vmatpush.msra.mxu2 %v328_v1  ;;  %v395_v18 = vld [vmem:[#allocation2] sm:$0x1]  ;;  %s1011_s4 = smov (!%p309_p1, %s306_s4), 5  ;;  %v419_v39 = vld [vmem:[#allocation3] sm:$0x1]  ;;  %s629_s21 = sshll.u32 %s279_s11, 3 }
  0x20   : > { %s315_s5 = sadd.s32 %s916_s6, %s1011_s4  ;;  %v456_v45 = vld [vmem:[#allocation4] sm:$0xff]  ;;  %s637_s6 = sshll.u32 %s806_s16, 1 }
  0x21   : > { %s632_s7 = sshll.u32 %s315_s5, 3  ;;  %s487_s20 = sadd.s32 %s802_s15, %s637_s6 }
  0x22   : > { %s317_s10 = scalar_lea.vmem %s991_s2, %s632_s7  ;;  %s638_s24 = sshll.u32 %s487_s20, 3 }
  0x23   : > { %v330_v30 = vld [vmem:[%s317_s10] sm:$0xff]  ;;  %s489_s29 = scalar_lea.hbm %s992_s3, %s638_s24  ;;  %s281_s4 = scalar_lea.vmem [#allocation5], %s629_s21 }
  0x24   : > { %s491_s5 = sshll.u32 %s281_s4, 4  ;;  %s493_s16 = sshll.u32 %s489_s29, 4  ;;  %s492_s5 = int_to_ptr.vmem [resolvable:$true] %s491_s5  ;;  %s494_s16 = int_to_ptr.hbm [resolvable:$true] %s493_s16 }
  0x25   : > { %s476_s15 = scalar_lea.sflag [#allocation6], %s279_s11  ;;  %s738_s7 = sshra.s32 %s494_s16, 4  ;;  %s739_s7 = int_to_ptr.hbm [resolvable:$true] %s738_s7 }
  0x26   : > { %s740_s8 = scalar_lea.hbm %s739_s7, 8  ;;  %s744_s6 = scalar_lea.hbm %s992_s3, 32 }
  0x27   : > { %p741_p2 = scmp.ne.s32.totalorder %s739_s7, %s740_s8  ;;  %p745_p6 = scmp.lt.s32.totalorder %s739_s7, %s992_s3 }
  0x28   : > { %p746_p7 = scmp.lt.s32.totalorder %s744_s6, %s740_s8 }
  0x29   : > { %p742_p4 = pnand %p741_p2, %p893_p3 }
  0x2a   : > { %p747_p9 = por %p746_p7, %p745_p6 }
  0x2b   : > { %p743_p5 = pneg %p742_p4 }
  0x2d   : > { %p748_p10 = pnand %p747_p9, %p743_p5 }
  0xc2   : > { %v347_v2 = vpop.trf.xlu0 }
  0xc3   : > { %633 = vmatmul.msk.f32.vlgmr.msra.gmra.mxu0 %vm363_vm0, %v347_v2 }
  0xca   : > { %v348_v3 = vpop.trf.xlu0 }
  0xcb   : > { %634 = vmatmul.msk.f32.vlgmr.msra.gmra.mxu2 %vm363_vm0, %v348_v3 }
 0x140   : > { %v387_v6 = vpop.f32.mrf.mxu0 }
 0x141   : > { %v393_v7 = vmul.f32 0.35355338, %v387_v6 }
 0x143   : > { %v397_v10 = vsel %vm326_vm2, %v393_v7, -inf }
 0x14e   : > { %v390_v8 = vpop.f32.mrf.mxu2 }
 0x14f   : > { %v394_v9 = vmul.f32 0.35355338, %v390_v8 }
 0x151   : > { %v398_v11 = vsel %vm326_vm2, %v394_v9, -inf }
 0x152   : > { %v399_v12 = vmax.f32 %v397_v10, %v398_v11 }
 0x154   : > { %v400_v13 = vrot.slane %v399_v12, 4 }
 0x156   : > { %v401_v14 = vmax.f32 %v399_v12, %v400_v13 }
 0x158   : > { %v402_v15 = vrot.slane %v401_v14, 2 }
 0x15a   : > { %v403_v16 = vmax.f32 %v401_v14, %v402_v15 }
 0x15c   : > { %v404_v17 = vrot.slane %v403_v16, 1 }
 0x15e   : > { %v405_v19 = vmax.f32 %v403_v16, %v404_v17 }
 0x160   : > { %v406_v20 = vmax.f32 %v395_v18, %v405_v19 }
 0x162   : > { %v411_v21 = vperm.slane %v406_v20, 0  ;;  %463 = vst.msk [vmem:[#allocation2] sm:$0x1] %vm323_vm1, %v406_v20  ;;  %v407_v26 = vsub.f32 %v395_v18, %v406_v20 }
 0x164   : > { %v413_v22 = vsub.f32 %v393_v7, %v411_v21  ;;  %v414_v23 = vsub.f32 %v394_v9, %v411_v21  ;;  %v408_v32 = vmul.f32 1.442695, %v407_v26 }
 0x166   : > { %v415_v24 = vmul.f32 1.442695, %v413_v22  ;;  %v417_v25 = vmul.f32 1.442695, %v414_v23 }
 0x168   : > { %716 = vpow2.f32 %v417_v25 }
 0x169   : > { %718 = vpow2.f32 %v415_v24 }
 0x16a   : > { %720 = vpow2.f32 %v408_v32 }
 0x16e   : > { %v717_v27 = vpop.eup %716 }
 0x16f   : > { %v719_v28 = vpop.eup %718  ;;  %v422_v29 = vsel %vm326_vm2, %v717_v27, 0.0  ;;  %450 = vmatpush.msra.mxu1 %v717_v27 }
 0x170   : > { %v421_v31 = vsel %vm326_vm2, %v719_v28, 0.0  ;;  %v721_v38 = vpop.eup %720 }
 0x171   : > { %v423_v33 = vadd.f32 %v422_v29, %v421_v31  ;;  %451 = vmatpush.msra.mxu1 %v719_v28  ;;  %v420_v42 = vmul.f32 %v721_v38, %v419_v39  ;;  %v458_v44 = vperm.slane %v721_v38, 0 }
 0x172   : > { %635 = vmatmul.msk.f32.vlgmr.msra.gmra.mxu1 %vm326_vm2, %v330_v30 }
 0x173   : > { %v424_v34 = vrot.slane %v423_v33, 4  ;;  %v460_v47 = vmul.f32 %v458_v44, %v456_v45 }
 0x175   : > { %v425_v35 = vadd.f32 %v424_v34, %v423_v33 }
 0x177   : > { %v426_v36 = vrot.slane %v425_v35, 2 }
 0x179   : > { %v427_v37 = vadd.f32 %v426_v36, %v425_v35 }
 0x17b   : > { %v428_v40 = vrot.slane %v427_v37, 1 }
 0x17d   : > { %v429_v41 = vadd.f32 %v428_v40, %v427_v37 }
 0x17f   : > { %v430_v43 = vadd.f32 %v429_v41, %v420_v42 }
 0x181   : > { %432 = vst.msk [vmem:[#allocation3] sm:$0x1] %vm323_vm1, %v430_v43 }
 0x188   : > { %v467_v46 = vld [vmem:[#allocation3] sm:$0x1] }
 0x189   : > { %722 = vrcp.f32 %v467_v46 }
 0x18f   : > { %v723_v50 = vpop.eup %722 }
 0x190   : > { %v471_v51 = vperm.slane %v723_v50, 0 }
 0x1ef   : > { %v453_v48 = vpop.f32.mrf.mxu1 }
 0x1f0   : > { %v461_v49 = vadd.f32 %v460_v47, %v453_v48 }
 0x1f2   : > { %462 = vst.msk [vmem:[#allocation4] sm:$0xff] %vm326_vm2, %v461_v49 }
 0x1f9   : > { %v469_v52 = vld [vmem:[#allocation4] sm:$0xff] }
 0x1fa   : > { %v473_v53 = vmul.f32 %v471_v51, %v469_v52 }
 0x1fc   : > { %474 = vst.msk [vmem:[%s281_s4] sm:$0xff] %vm326_vm2, %v473_v53 }
 0x1fd   : > { %751 = shalt.err (!%p748_p10)
}
 0x1fe   : > { %643 = dma.vmem_to_hbm [thread:$0]  (%p893_p3), %s492_s5, 128, %s494_s16, %s476_s15  }
 0x1ff PF: > { %p649_p11 = scmp.ge.s32.totalorder %s818_s19, 2  ;;  %s505_s11 = sand.u32 1, %s790_s12  }
 0x200   : > { %s506_s24 = scalar_lea.sflag [#allocation6], %s505_s11 }
 0x201   : > { %p646_p12 = pnand %p649_p11, %p902_p8 }
 0x203   : > { %p647_p13 = pneg %p646_p12 }
 0x205   : > { %785 = dma.done.wait (%p647_p13), %s506_s24, 128  }
 0x206   : > { %787 = vsyncadd (%p647_p13), %s506_s24, 4294967168  ;;  %s16_s19 = sadd.s32 1, %s818_s19   ;;  %s995_s12 = smov %s794_s13 }
 0x207   : > { %p13_p0 = scmp.ge.s32.totalorder %s16_s19, 6   ;;  %s996_s13 = smov %s798_s14 }
 0x208   : > { %s997_s14 = smov %s911_s30  ;;  %s998_s15 = smov %s810_s17 }
 0x209   : > { %s999_s16 = smov %s814_s18  ;;  %s1000_s17 = smov %s1003_s22 }
 0x20a   : > { %s1001_s18 = smov %s1007_s23  ;;  %15 = sbr.rel (!%p13_p0) target bundleno = 5 (0x5), region = 81 }
 0x20f   :  { %512 = vsyncpa [#allocation6], 1 }
 0x210   :  { %514 = vsyncpa [#allocation6 + $0x1], 1 }

</bundles_post_ra>
